<compile_context>
chip_gen: v5e
topology: v5e:2x2
jax: 0.10.0
libtpu: 0.0.40
codegen_flags: <defaults>
</compile_context>

<pallas_src>
import jax
import jax.numpy as jnp
from jax.experimental import pallas as pl
from jax.experimental.pallas import tpu as pltpu


def _cdiv(a: int, b: int) -> int:
    return -(-a // b)


def _round_up(a: int, b: int) -> int:
    return _cdiv(a, b) * b


def _default_row_tile() -> int:
    """512 rows (2 MiB f32 tile) everywhere; 1024 on v7x (faster HBM)."""
    try:
        kind = jax.devices()[0].device_kind.lower()
    except Exception:
        return 512
    if "v7" in kind:
        return 1024
    return 512


def _choose_lane_width(total: int):
    """Largest lane width in {1024,512,256,128} that divides total (no pad)."""
    for lw in (1024, 512, 256, 128):
        if total % lw == 0:
            return lw, total
    # Fallback: pad up to a multiple of 128 lanes (rare, small extra traffic).
    return 128, _round_up(total, 128)


def _make_poly_kernel(num_coeffs: int):
    """Kernel with a statically-unrolled Horner evaluation."""

    def poly_kernel(coeff_ref, x_ref, o_ref):
        # coeff_ref: SMEM (num_coeffs,) f32 scalars
        # x_ref / o_ref: VMEM (TM, LANE_WIDTH) tiles
        x = x_ref[...]
        if num_coeffs == 1:
            o_ref[...] = jnp.full_like(x, coeff_ref[0])
            return
        # Horner: acc = x*c[n-1] + c[n-2]; acc = acc*x + c[i] for i = n-3..0
        acc = x * coeff_ref[num_coeffs - 1] + coeff_ref[num_coeffs - 2]
        for i in range(num_coeffs - 3, -1, -1):
            acc = acc * x + coeff_ref[i]
        o_ref[...] = acc

    return poly_kernel


def polynomial_activation(x, coefficients):
    """x: float32 tensor (any shape); coefficients: (max_degree + 1,) float32."""
    orig_shape = x.shape
    total = x.size
    num_coeffs = coefficients.shape[0]

    lane_width, padded_total = _choose_lane_width(total)
    rows = padded_total // lane_width

    # Row-tile selection: multiple-of-8 tiles, >=2 grid blocks when possible
    # (so v7x's two TensorCores both get work); a single full-dim block for
    # tiny inputs.
    row_tile = _default_row_tile()
    if rows <= 8:
        tm = rows                                   # block dim == full array dim
    else:
        tm = min(row_tile, _round_up(_cdiv(rows, 2), 8))
    grid = (_cdiv(rows, tm),)                       # partial last block is masked

    # Flatten (copy-free reshape in the common no-pad path).
    x_flat = x.reshape(-1)
    if padded_total != total:
        x_flat = jnp.pad(x_flat, (0, padded_total - total))
    x2d = x_flat.reshape(rows, lane_width)

    kernel = _make_poly_kernel(num_coeffs)

    out2d = pl.pallas_call(
        kernel,
        out_shape=jax.ShapeDtypeStruct(x2d.shape, x2d.dtype),
        grid=grid,
        in_specs=[
            pl.BlockSpec(memory_space=pltpu.SMEM),                 # coefficients
            pl.BlockSpec((tm, lane_width), lambda i: (i, 0)),      # x tile
        ],
        out_specs=pl.BlockSpec((tm, lane_width), lambda i: (i, 0)),
        compiler_params=pltpu.CompilerParams(
            dimension_semantics=("parallel",),
            vmem_limit_bytes=32 << 20,   # covers (1024,1024) f32 double-buffered
        ),
        cost_estimate=pl.CostEstimate(
            flops=2 * max(num_coeffs - 1, 0) * padded_total,
            transcendentals=0,
            bytes_accessed=2 * 4 * padded_total,   # read + write f32
        ),
    )(coefficients, x2d)

    out_flat = out2d.reshape(-1)
    if padded_total != total:
        out_flat = out_flat[:total]
    return out_flat.reshape(orig_shape)


if __name__ == "__main__":
    key = jax.random.PRNGKey(0)
    k_x, k_coef = jax.random.split(key)

    # Module config: max_degree = 3 -> 4 coefficients (torch.randn(max_degree+1))
    max_degree = 3
    coefficients = jax.random.normal(k_coef, (max_degree + 1,), dtype=jnp.float32)

    # Small NCHW input
    x = jax.random.normal(k_x, (2, 4, 16, 16), dtype=jnp.float32)

    out = polynomial_activation(x, coefficients)
    out = jax.block_until_ready(out)

    # Reference check in plain JAX (same left-to-right sum as PyTorch)
    ref = sum(coefficients[i] * jnp.power(x, i) for i in range(max_degree + 1))
    assert out.shape == x.shape
    assert jnp.allclose(out, ref, atol=1e-5, rtol=1e-5)

    print("KERNEL_OK")
</pallas_src>

<mosaic_0001>
module attributes {stable_mosaic.version = 11 : i64} {
  func.func @poly_kernel(%arg0: i32, %arg1: memref<4xf32, #tpu.memory_space<smem>>, %arg2: memref<2x1024xf32, #tpu.memory_space<vmem>>, %arg3: memref<2x1024xf32, #tpu.memory_space<vmem>>) attributes {dimension_semantics = [#tpu.dimension_semantics<parallel>], iteration_bounds = array<i64: 1>, scalar_prefetch = 0 : i64, scratch_operands = 0 : i64, tpu.core_type = #tpu.core_type<tc>, window_params = [{transform_indices = @transform_0, window_bounds = array<i64: 4>}, {transform_indices = @transform_1, window_bounds = array<i64: 2, 1024>}, {transform_indices = @transform_2, window_bounds = array<i64: 2, 1024>}]} {
    %c0 = arith.constant 0 : index
    %c0_0 = arith.constant 0 : index
    %0 = vector.load %arg2[%c0, %c0_0] : memref<2x1024xf32, #tpu.memory_space<vmem>>, vector<2x1024xf32>
    %c3 = arith.constant 3 : index
    %1 = memref.load %arg1[%c3] : memref<4xf32, #tpu.memory_space<smem>>
    %2 = vector.broadcast %1 : f32 to vector<2x1024xf32>
    %3 = arith.mulf %0, %2 : vector<2x1024xf32>
    %c2 = arith.constant 2 : index
    %4 = memref.load %arg1[%c2] : memref<4xf32, #tpu.memory_space<smem>>
    %5 = vector.broadcast %4 : f32 to vector<2x1024xf32>
    %6 = arith.addf %3, %5 : vector<2x1024xf32>
    %7 = arith.mulf %6, %0 : vector<2x1024xf32>
    %c1 = arith.constant 1 : index
    %8 = memref.load %arg1[%c1] : memref<4xf32, #tpu.memory_space<smem>>
    %9 = vector.broadcast %8 : f32 to vector<2x1024xf32>
    %10 = arith.addf %7, %9 : vector<2x1024xf32>
    %11 = arith.mulf %10, %0 : vector<2x1024xf32>
    %c0_1 = arith.constant 0 : index
    %12 = memref.load %arg1[%c0_1] : memref<4xf32, #tpu.memory_space<smem>>
    %13 = vector.broadcast %12 : f32 to vector<2x1024xf32>
    %14 = arith.addf %11, %13 : vector<2x1024xf32>
    %c0_2 = arith.constant 0 : index
    %c0_3 = arith.constant 0 : index
    %15 = vector.load %arg3[%c0_2, %c0_3] : memref<2x1024xf32, #tpu.memory_space<vmem>>, vector<2x1024xf32>
    tpu.vector_store %arg3[%c0_2, %c0_3], %14 {strides = array<i32>} : memref<2x1024xf32, #tpu.memory_space<vmem>>, vector<2x1024xf32>,
    return
  }
  func.func @transform_0(%arg0: i32) -> i32 {
    %c0_i32 = arith.constant 0 : i32
    %c0_i32_0 = arith.constant 0 : i32
    return %c0_i32 : i32
  }
  func.func @transform_1(%arg0: i32) -> (i32, i32) {
    %c0_i32 = arith.constant 0 : i32
    %c0_i32_0 = arith.constant 0 : i32
    return %arg0, %c0_i32 : i32, i32
  }
  func.func @transform_2(%arg0: i32) -> (i32, i32) {
    %c0_i32 = arith.constant 0 : i32
    %c0_i32_0 = arith.constant 0 : i32
    return %arg0, %c0_i32 : i32, i32
  }
}

</mosaic_0001>

<bundles_post_ra>
// kernel: tpu_custom_call.1
= control target key start
LH: loop header
LB: loop body
LE: loop exit
PB: predicated region body
PF: predicated region fallthrough
CT: control target
= control target key end

     0   :  { %7 = vsyncpa [#allocation5], 0  ;;  %s180_s0 = inlined_call_operand.hbm [shape: f32[4], index: 0, kind: input, shape index: {}]   ;;  %s181_s1 = inlined_call_operand.hbm [shape: f32[2,1024], index: 1, kind: input, shape index: {}]   ;;  %s182_s2 = inlined_call_operand.hbm [shape: f32[2,1024], index: 2, kind: output, shape index: {}]  }
   0x1   :  { %8 = vsyncpa [#allocation3], 0 }
   0x2   :  { %9 = vsyncpa [#allocation4], 0  ;;  %s15_s11 = sshll.u32 %s180_s0, 4  ;;  %s24_s14 = sshll.u32 %s181_s1, 4  ;;  %s16_s11 = int_to_ptr.hbm [resolvable:$true] %s15_s11  ;;  %s25_s14 = int_to_ptr.hbm [resolvable:$true] %s24_s14 }
   0x3   :  { %s153_s15 = smov [#allocation2]   ;;  %s154_s16 = smov [#allocation6]  }
   0x4   :  { %18 = dma.hbm_to_smem %s16_s11, 16, %s153_s15, [#allocation5]  }
   0x5   :  { %s26_s17 = sshll.u32 %s154_s16, 4  ;;  %s27_s17 = int_to_ptr.vmem [resolvable:$true] %s26_s17 }
   0x6   :  { %29 = dma.hbm_to_vmem [thread:$0]  %s25_s14, 256, %s27_s17, [#allocation3]  }
   0x7   :  { %147 = dma.done.wait [#allocation5], 16  }
   0x8   :  { %148 = vsyncadd [#allocation5], 4294967280 }
   0x9   :  { %149 = dma.done.wait [#allocation3], 256  }
   0xa   :  { %150 = vsyncadd [#allocation3], 4294967040 }
   0xb   :  { %38 = sfence }
   0xc   :  { %s81_s18 = sld [smem:[#allocation2 + $0x3]]  ;;  %v39_v0 = vld [vmem:[#allocation6] sm:$0xff]  ;;  %v40_v1 = vld [vmem:[#allocation6 + $0x8] sm:$0xff]  ;;  %s155_s1 = smov [#allocation7]  }
   0xd   :  { %s82_s19 = sld [smem:[#allocation2 + $0x2]]  ;;  %s68_s21 = sshll.u32 %s155_s1, 4  ;;  %s69_s21 = int_to_ptr.vmem [resolvable:$true] %s68_s21 }
   0xe   :  { %s83_s0 = sld [smem:[#allocation2 + $0x1]]  ;;  %s70_s24 = sshll.u32 %s182_s2, 4  ;;  %s71_s24 = int_to_ptr.hbm [resolvable:$true] %s70_s24 }
   0xf   :  { %s57_s20 = sld [smem:[#allocation2]] }
  0x12   :  { %v42_v2 = vstv %s81_s18 }
  0x13   :  { %v43_v3 = vmul.f32 %v42_v2, %v39_v0  ;;  %v46_v4 = vstv %s82_s19  ;;  %v44_v5 = vmul.f32 %v42_v2, %v40_v1 }
  0x14   :  { %v52_v8 = vstv %s83_s0 }
  0x15   :  { %v47_v6 = vadd.f32 %v46_v4, %v43_v3  ;;  %v48_v7 = vadd.f32 %v46_v4, %v44_v5  ;;  %v58_v13 = vstv %s57_s20 }
  0x17   :  { %v49_v9 = vmul.f32 %v47_v6, %v39_v0  ;;  %v50_v10 = vmul.f32 %v48_v7, %v40_v1 }
  0x19   :  { %v53_v11 = vadd.f32 %v52_v8, %v49_v9  ;;  %v54_v12 = vadd.f32 %v52_v8, %v50_v10 }
  0x1b   :  { %v55_v14 = vmul.f32 %v53_v11, %v39_v0  ;;  %v56_v15 = vmul.f32 %v54_v12, %v40_v1 }
  0x1d   :  { %v59_v16 = vadd.f32 %v58_v13, %v55_v14  ;;  %v60_v17 = vadd.f32 %v58_v13, %v56_v15 }
  0x1f   :  { %61 = vst [vmem:[#allocation7] sm:$0xff] %v59_v16 }
  0x20   :  { %62 = vst [vmem:[#allocation7 + $0x8] sm:$0xff] %v60_v17 }
  0x21   :  { %73 = dma.vmem_to_hbm [thread:$0]  %s69_s21, 256, %s71_s24, [#allocation4]  }
  0x22   :  { %151 = dma.done.wait [#allocation4], 256  }
  0x23   :  { %152 = vsyncadd [#allocation4], 4294967040 }
  0x24   :  { %78 = vsyncpa [#allocation3], 1 }
  0x25   :  { %79 = vsyncpa [#allocation4], 1 }
  0x26   :  { %80 = vsyncpa [#allocation5], 1 }

</bundles_post_ra>
